<compile_context>
chip_gen: v5e
topology: v5e:2x2
jax: 0.10.0
libtpu: 0.0.40
codegen_flags: <defaults>
</compile_context>

<pallas_src>
import functools
import numpy as np
import jax
import jax.numpy as jnp
from jax.experimental import pallas as pl
from jax.experimental.pallas import tpu as pltpu


def _round_up(x, m):
    return ((x + m - 1) // m) * m


def _gnimc_kernel(rank, num_hints,
                  scal_ref,              # SMEM (3,): [bias_sum, var_w_last, var_bias]
                  z_ref, h_ref,          # VMEM (tb, q), (tb, hd)
                  Wz_ref, Wh_ref,        # VMEM (q, r+NH+1), (hd, r+1)
                  bc_ref,                # VMEM (1, NH)
                  out_ref):              # VMEM (tb, NH+2) = [logits | mu | sig]
    z = z_ref[...]
    h = h_ref[...]

    # Two fused MXU pushes (instead of 3 matmuls + 2 dot-product reductions).
    az = jnp.dot(z, Wz_ref[...], preferred_element_type=jnp.float32)   # (tb, r+NH+1)
    ah = jnp.dot(h, Wh_ref[...], preferred_element_type=jnp.float32)   # (tb, r+1)

    u = az[:, :rank]                                                   # z @ U
    logits = az[:, rank:rank + num_hints] + bc_ref[...]                # z @ Wc.T + bc
    uwu = az[:, rank + num_hints:rank + num_hints + 1]                 # sum(u * wu)
    v = ah[:, :rank]                                                   # h @ V
    vwv = ah[:, rank:rank + 1]                                         # sum(v * wv)

    # Remaining cross-lane work: two small XLU reductions on the VPU products.
    inter = jnp.sum(u * v, axis=1, keepdims=True)                      # (tb,1)
    absdiff = jnp.sum(jnp.abs(u - v), axis=1, keepdims=True)           # (tb,1)

    mu = inter + scal_ref[0]                                           # + (wz+bz+wh+bh)
    pre = uwu + vwv + absdiff * scal_ref[1] + scal_ref[2]              # phi @ var_w + b
    sig = jax.nn.softplus(pre) + 1e-4

    # Single lane-dense store of the packed output slab.
    out_ref[...] = jnp.concatenate([logits, mu, sig], axis=1)


def init_params(key, q_dim, h_dim, rank, num_hints):
    ks = jax.random.split(key, 8)
    return {
        "U": jax.random.normal(ks[0], (q_dim, rank), jnp.float32) * 0.2,
        "V": jax.random.normal(ks[1], (h_dim, rank), jnp.float32) * 0.2,
        # nn.Linear(1,1): single weight + single bias
        "bias_z_w": jax.random.normal(ks[2], (), jnp.float32) * 0.1,
        "bias_z_b": jax.random.normal(ks[3], (), jnp.float32) * 0.1,
        "bias_h_w": jax.random.normal(ks[4], (), jnp.float32) * 0.1,
        "bias_h_b": jax.random.normal(ks[5], (), jnp.float32) * 0.1,
        # var_raw: weight = 0, bias = log(expm1(1)) per the module's init
        "var_w": jnp.zeros((2 * rank + 1,), jnp.float32),
        "var_b": jnp.asarray(np.log(np.expm1(1.0)), jnp.float32),
        # classifier Linear(q_dim, num_hints)
        "Wc": jax.random.normal(ks[6], (num_hints, q_dim), jnp.float32) * 0.1,
        "bc": jax.random.normal(ks[7], (num_hints,), jnp.float32) * 0.1,
    }


def prepare_params(params):
    """One-time layout plumbing (transposes/stacks/weight fusion hoisted out
    of the per-call path)."""
    rank = params["U"].shape[1]
    num_hints = params["Wc"].shape[0]
    wu = params["var_w"][:rank]
    wv = params["var_w"][rank:2 * rank]
    # Fused z-side weight: [U | Wc.T | U@wu]  -> (q, rank + num_hints + 1)
    Wz = jnp.concatenate(
        [params["U"], params["Wc"].T, (params["U"] @ wu)[:, None]], axis=1)
    # Fused h-side weight: [V | V@wv]         -> (hd, rank + 1)
    Wh = jnp.concatenate([params["V"], (params["V"] @ wv)[:, None]], axis=1)
    # bias_z(ones) + bias_h(ones) is a data-independent constant.
    bias_sum = (params["bias_z_w"] + params["bias_z_b"]
                + params["bias_h_w"] + params["bias_h_b"])
    scal = jnp.stack(
        [bias_sum, params["var_w"][2 * rank], params["var_b"]]).astype(jnp.float32)
    return {
        "Wz": Wz.astype(jnp.float32),
        "Wh": Wh.astype(jnp.float32),
        "scal": scal,
        "bc": params["bc"].reshape(1, num_hints).astype(jnp.float32),
        "rank": int(rank),
        "num_hints": int(num_hints),
    }


def gnimc_forward(fused, z, h, *, max_rows_per_step=1024):
    """fused: output of prepare_params. z: (B,q) or (q,), h: (B,hd) or (hd,)."""
    if z.ndim == 1:
        z = z[None, :]
    if h.ndim == 1:
        h = h[None, :]
    if z.shape[0] != h.shape[0]:
        if z.shape[0] == 1:
            z = jnp.broadcast_to(z, (h.shape[0], z.shape[1]))
        else:
            h = jnp.broadcast_to(h, (z.shape[0], h.shape[1]))
    z = z.astype(jnp.float32)
    h = h.astype(jnp.float32)

    B, q_dim = z.shape
    _, h_dim = h.shape
    rank = fused["rank"]
    num_hints = fused["num_hints"]
    cz = rank + num_hints + 1
    ch = rank + 1
    out_w = num_hints + 2

    # Batch tiling: multiples of 8 sublanes, up to max_rows_per_step per step.
    b8 = _round_up(B, 8)
    tb = min(_round_up(max_rows_per_step, 8), b8)
    Bp = _round_up(b8, tb)
    if Bp != B:
        z = jnp.pad(z, ((0, Bp - B), (0, 0)))
        h = jnp.pad(h, ((0, Bp - B), (0, 0)))
    n_steps = Bp // tb

    kernel = functools.partial(_gnimc_kernel, rank, num_hints)

    cost = pl.CostEstimate(
        flops=2 * Bp * (q_dim * cz + h_dim * ch) + 6 * Bp * rank,
        transcendentals=2 * Bp,
        bytes_accessed=4 * (Bp * (q_dim + h_dim + out_w)
                            + q_dim * cz + h_dim * ch + num_hints + 3),
    )

    packed = pl.pallas_call(
        kernel,
        grid=(n_steps,),
        in_specs=[
            pl.BlockSpec(memory_space=pltpu.MemorySpace.SMEM),       # scal (3,)
            pl.BlockSpec((tb, q_dim), lambda i: (i, 0)),             # z tile
            pl.BlockSpec((tb, h_dim), lambda i: (i, 0)),             # h tile
            pl.BlockSpec((q_dim, cz), lambda i: (0, 0)),             # Wz (resident)
            pl.BlockSpec((h_dim, ch), lambda i: (0, 0)),             # Wh (resident)
            pl.BlockSpec((1, num_hints), lambda i: (0, 0)),          # bc (resident)
        ],
        out_specs=pl.BlockSpec((tb, out_w), lambda i: (i, 0)),
        out_shape=jax.ShapeDtypeStruct((Bp, out_w), jnp.float32),
        compiler_params=pltpu.CompilerParams(
            dimension_semantics=("parallel",)),
        cost_estimate=cost,
    )(fused["scal"], z, h, fused["Wz"], fused["Wh"], fused["bc"])

    logits = packed[:B, :num_hints]
    mu = packed[:B, num_hints]
    sig = packed[:B, num_hints + 1]
    return mu, sig, logits


def reference_forward(params, z, h):
    """Plain-JAX reference mirroring the PyTorch forward, for sanity checking."""
    u = z @ params["U"]
    v = h @ params["V"]
    inter = jnp.sum(u * v, axis=1)
    bias = (params["bias_z_w"] + params["bias_z_b"]
            + params["bias_h_w"] + params["bias_h_b"])
    mu = inter + bias
    phi = jnp.concatenate(
        [u, v, jnp.sum(jnp.abs(u - v), axis=1, keepdims=True)], axis=1)
    sig = jax.nn.softplus(phi @ params["var_w"] + params["var_b"]) + 1e-4
    logits = z @ params["Wc"].T + params["bc"]
    return mu, sig, logits


if __name__ == "__main__":
    B, q_dim, h_dim, rank, num_hints = 8, 32, 32, 8, 16

    key = jax.random.PRNGKey(0)
    kp, kz, kh, kvw, kz2, kh2 = jax.random.split(key, 6)
    params = init_params(kp, q_dim, h_dim, rank, num_hints)
    # The module inits var_raw.weight to zero; use a small nonzero weight here
    # so the test actually exercises the variance-head (wu/wv/|u-v|) path.
    params["var_w"] = jax.random.normal(kvw, (2 * rank + 1,), jnp.float32) * 0.1

    fused = prepare_params(params)

    # Case 1: demo batch (single grid step).
    z = jax.random.normal(kz, (B, q_dim), jnp.float32)
    h = jax.random.normal(kh, (B, h_dim), jnp.float32)
    mu, sig, logits = gnimc_forward(fused, z, h)
    jax.block_until_ready((mu, sig, logits))
    mu_r, sig_r, logits_r = reference_forward(params, z, h)
    np.testing.assert_allclose(np.asarray(mu), np.asarray(mu_r), rtol=1e-5, atol=1e-5)
    np.testing.assert_allclose(np.asarray(sig), np.asarray(sig_r), rtol=1e-5, atol=1e-5)
    np.testing.assert_allclose(np.asarray(logits), np.asarray(logits_r), rtol=1e-5, atol=1e-5)

    # Case 2: batch not a multiple of 8 (exercises the padding/slicing path).
    B2 = 20
    z2 = jax.random.normal(kz2, (B2, q_dim), jnp.float32)
    h2 = jax.random.normal(kh2, (B2, h_dim), jnp.float32)
    mu2, sig2, logits2 = gnimc_forward(fused, z2, h2)
    jax.block_until_ready((mu2, sig2, logits2))
    mu2_r, sig2_r, logits2_r = reference_forward(params, z2, h2)
    np.testing.assert_allclose(np.asarray(mu2), np.asarray(mu2_r), rtol=1e-5, atol=1e-5)
    np.testing.assert_allclose(np.asarray(sig2), np.asarray(sig2_r), rtol=1e-5, atol=1e-5)
    np.testing.assert_allclose(np.asarray(logits2), np.asarray(logits2_r), rtol=1e-5, atol=1e-5)

    print("KERNEL_OK")
</pallas_src>

<mosaic_0001>
module attributes {stable_mosaic.version = 11 : i64} {
  func.func @_gnimc_kernel(%arg0: i32, %arg1: memref<3xf32, #tpu.memory_space<smem>>, %arg2: memref<8x32xf32, #tpu.memory_space<vmem>>, %arg3: memref<8x32xf32, #tpu.memory_space<vmem>>, %arg4: memref<32x25xf32, #tpu.memory_space<vmem>>, %arg5: memref<32x9xf32, #tpu.memory_space<vmem>>, %arg6: memref<1x16xf32, #tpu.memory_space<vmem>>, %arg7: memref<8x18xf32, #tpu.memory_space<vmem>>) attributes {dimension_semantics = [#tpu.dimension_semantics<parallel>], iteration_bounds = array<i64: 1>, scalar_prefetch = 0 : i64, scratch_operands = 0 : i64, tpu.core_type = #tpu.core_type<tc>, window_params = [{transform_indices = @transform_0, window_bounds = array<i64: 3>}, {transform_indices = @transform_1, window_bounds = array<i64: 8, 32>}, {transform_indices = @transform_2, window_bounds = array<i64: 8, 32>}, {pipeline_mode = #tpu.pipeline_mode<synchronous>, transform_indices = @transform_3, window_bounds = array<i64: 32, 25>}, {pipeline_mode = #tpu.pipeline_mode<synchronous>, transform_indices = @transform_4, window_bounds = array<i64: 32, 9>}, {pipeline_mode = #tpu.pipeline_mode<synchronous>, transform_indices = @transform_5, window_bounds = array<i64: 1, 16>}, {transform_indices = @transform_6, window_bounds = array<i64: 8, 18>}]} {
    %c0 = arith.constant 0 : index
    %c0_0 = arith.constant 0 : index
    %0 = vector.load %arg2[%c0, %c0_0] : memref<8x32xf32, #tpu.memory_space<vmem>>, vector<8x32xf32>
    %c0_1 = arith.constant 0 : index
    %c0_2 = arith.constant 0 : index
    %1 = vector.load %arg3[%c0_1, %c0_2] : memref<8x32xf32, #tpu.memory_space<vmem>>, vector<8x32xf32>
    %c0_3 = arith.constant 0 : index
    %c0_4 = arith.constant 0 : index
    %2 = vector.load %arg4[%c0_3, %c0_4] : memref<32x25xf32, #tpu.memory_space<vmem>>, vector<32x25xf32>
    %cst = arith.constant dense<0.000000e+00> : vector<8x25xf32>
    %3 = tpu.matmul %0, %2, %cst {dimension_numbers = #tpu.dot_dimension_numbers<[1], [0], [0], [1], [0, 0, 1, 1], [], []>} : vector<8x32xf32>, vector<32x25xf32>, vector<8x25xf32> -> vector<8x25xf32>
    %c0_5 = arith.constant 0 : index
    %c0_6 = arith.constant 0 : index
    %4 = vector.load %arg5[%c0_5, %c0_6] : memref<32x9xf32, #tpu.memory_space<vmem>>, vector<32x9xf32>
    %cst_7 = arith.constant dense<0.000000e+00> : vector<8x9xf32>
    %5 = tpu.matmul %1, %4, %cst_7 {dimension_numbers = #tpu.dot_dimension_numbers<[1], [0], [0], [1], [0, 0, 1, 1], [], []>} : vector<8x32xf32>, vector<32x9xf32>, vector<8x9xf32> -> vector<8x9xf32>
    %6 = vector.extract_strided_slice %3 {offsets = [0, 0], sizes = [8, 8], strides = [1, 1]} : vector<8x25xf32> to vector<8x8xf32>
    %7 = vector.extract_strided_slice %3 {offsets = [0, 8], sizes = [8, 16], strides = [1, 1]} : vector<8x25xf32> to vector<8x16xf32>
    %c0_8 = arith.constant 0 : index
    %c0_9 = arith.constant 0 : index
    %8 = vector.load %arg6[%c0_8, %c0_9] : memref<1x16xf32, #tpu.memory_space<vmem>>, vector<1x16xf32>
    %9 = vector.broadcast %8 : vector<1x16xf32> to vector<8x16xf32>
    %10 = arith.addf %7, %9 : vector<8x16xf32>
    %11 = vector.extract_strided_slice %3 {offsets = [0, 24], sizes = [8, 1], strides = [1, 1]} : vector<8x25xf32> to vector<8x1xf32>
    %12 = vector.extract_strided_slice %5 {offsets = [0, 0], sizes = [8, 8], strides = [1, 1]} : vector<8x9xf32> to vector<8x8xf32>
    %13 = vector.extract_strided_slice %5 {offsets = [0, 8], sizes = [8, 1], strides = [1, 1]} : vector<8x9xf32> to vector<8x1xf32>
    %14 = arith.mulf %6, %12 : vector<8x8xf32>
    %cst_10 = arith.constant dense<0.000000e+00> : vector<8xf32>
    %15 = vector.multi_reduction <add>, %14, %cst_10 [1] : vector<8x8xf32> to vector<8xf32>
    %16 = vector.shape_cast %15 : vector<8xf32> to vector<8x1xf32>
    %17 = arith.subf %6, %12 : vector<8x8xf32>
    %18 = math.absf %17 : vector<8x8xf32>
    %cst_11 = arith.constant dense<0.000000e+00> : vector<8xf32>
    %19 = vector.multi_reduction <add>, %18, %cst_11 [1] : vector<8x8xf32> to vector<8xf32>
    %20 = vector.shape_cast %19 : vector<8xf32> to vector<8x1xf32>
    %c0_12 = arith.constant 0 : index
    %21 = memref.load %arg1[%c0_12] : memref<3xf32, #tpu.memory_space<smem>>
    %22 = vector.broadcast %21 : f32 to vector<8x1xf32>
    %23 = arith.addf %16, %22 : vector<8x1xf32>
    %24 = arith.addf %11, %13 : vector<8x1xf32>
    %c1 = arith.constant 1 : index
    %25 = memref.load %arg1[%c1] : memref<3xf32, #tpu.memory_space<smem>>
    %26 = vector.broadcast %25 : f32 to vector<8x1xf32>
    %27 = arith.mulf %20, %26 : vector<8x1xf32>
    %28 = arith.addf %24, %27 : vector<8x1xf32>
    %c2 = arith.constant 2 : index
    %29 = memref.load %arg1[%c2] : memref<3xf32, #tpu.memory_space<smem>>
    %30 = vector.broadcast %29 : f32 to vector<8x1xf32>
    %31 = arith.addf %28, %30 : vector<8x1xf32>
    %cst_13 = arith.constant 0.000000e+00 : f32
    %32 = vector.broadcast %cst_13 : f32 to vector<8x1xf32>
    %33 = arith.maximumf %31, %32 : vector<8x1xf32>
    %34 = vector.broadcast %cst_13 : f32 to vector<8x1xf32>
    %35 = arith.subf %31, %34 : vector<8x1xf32>
    %36 = arith.cmpf one, %35, %35 : vector<8x1xf32>
    %37 = vector.broadcast %cst_13 : f32 to vector<8x1xf32>
    %38 = arith.addf %31, %37 : vector<8x1xf32>
    %39 = math.absf %35 : vector<8x1xf32>
    %cst_14 = arith.constant 0.000000e+00 : f32
    %40 = vector.broadcast %cst_14 : f32 to vector<8x1xf32>
    %41 = arith.subf %40, %39 : vector<8x1xf32>
    %42 = math.exp %41 : vector<8x1xf32>
    %43 = math.log1p %42 : vector<8x1xf32>
    %44 = arith.addf %33, %43 : vector<8x1xf32>
    %45 = arith.select %36, %38, %44 : vector<8x1xi1>, vector<8x1xf32>
    %cst_15 = arith.constant 9.99999974E-5 : f32
    %46 = vector.broadcast %cst_15 : f32 to vector<8x1xf32>
    %47 = arith.addf %45, %46 : vector<8x1xf32>
    %48 = tpu.concatenate %10, %23, %47 in 1 : vector<8x16xf32>, vector<8x1xf32>, vector<8x1xf32> -> vector<8x18xf32>
    %c0_16 = arith.constant 0 : index
    %c0_17 = arith.constant 0 : index
    %49 = vector.load %arg7[%c0_16, %c0_17] : memref<8x18xf32, #tpu.memory_space<vmem>>, vector<8x18xf32>
    tpu.vector_store %arg7[%c0_16, %c0_17], %48 {strides = array<i32>} : memref<8x18xf32, #tpu.memory_space<vmem>>, vector<8x18xf32>,
    return
  }
  func.func @transform_0(%arg0: i32) -> i32 {
    %c0_i32 = arith.constant 0 : i32
    %c0_i32_0 = arith.constant 0 : i32
    return %c0_i32 : i32
  }
  func.func @transform_1(%arg0: i32) -> (i32, i32) {
    %c0_i32 = arith.constant 0 : i32
    %c0_i32_0 = arith.constant 0 : i32
    return %arg0, %c0_i32 : i32, i32
  }
  func.func @transform_2(%arg0: i32) -> (i32, i32) {
    %c0_i32 = arith.constant 0 : i32
    %c0_i32_0 = arith.constant 0 : i32
    return %arg0, %c0_i32 : i32, i32
  }
  func.func @transform_3(%arg0: i32) -> (i32, i32) {
    %c0_i32 = arith.constant 0 : i32
    %c0_i32_0 = arith.constant 0 : i32
    %c0_i32_1 = arith.constant 0 : i32
    return %c0_i32, %c0_i32_0 : i32, i32
  }
  func.func @transform_4(%arg0: i32) -> (i32, i32) {
    %c0_i32 = arith.constant 0 : i32
    %c0_i32_0 = arith.constant 0 : i32
    %c0_i32_1 = arith.constant 0 : i32
    return %c0_i32, %c0_i32_0 : i32, i32
  }
  func.func @transform_5(%arg0: i32) -> (i32, i32) {
    %c0_i32 = arith.constant 0 : i32
    %c0_i32_0 = arith.constant 0 : i32
    %c0_i32_1 = arith.constant 0 : i32
    return %c0_i32, %c0_i32_0 : i32, i32
  }
  func.func @transform_6(%arg0: i32) -> (i32, i32) {
    %c0_i32 = arith.constant 0 : i32
    %c0_i32_0 = arith.constant 0 : i32
    return %arg0, %c0_i32 : i32, i32
  }
}

</mosaic_0001>

<bundles_post_ra>
// kernel: tpu_custom_call.1
= control target key start
LH: loop header
LB: loop body
LE: loop exit
PB: predicated region body
PF: predicated region fallthrough
CT: control target
= control target key end

     0   :  { %11 = vsyncpa [#allocation4], 0  ;;  %s311_s0 = inlined_call_operand.vmem [shape: f32[3], index: 0, kind: input, shape index: {}]   ;;  %s312_s1 = inlined_call_operand.vmem [shape: f32[8,32], index: 1, kind: input, shape index: {}]   ;;  %s313_s2 = inlined_call_operand.vmem [shape: f32[8,32], index: 2, kind: input, shape index: {}]   ;;  %s314_s3 = inlined_call_operand.vmem [shape: f32[32,25], index: 3, kind: input, shape index: {}]   ;;  %s315_s4 = inlined_call_operand.vmem [shape: f32[32,9], index: 4, kind: input, shape index: {}]   ;;  %s316_s5 = inlined_call_operand.vmem [shape: f32[1,16], index: 5, kind: input, shape index: {}]   ;;  %s317_s6 = inlined_call_operand.hbm [shape: f32[8,18], index: 6, kind: output, shape index: {}]  }
   0x1   :  { %12 = vsyncpa [#allocation3], 0  ;;  %s18_s23 = sshll.u32 %s311_s0, 4  ;;  %s231_s24 = smov [#allocation2]   ;;  %s19_s23 = int_to_ptr.vmem [resolvable:$true] %s18_s23 }
   0x2   :  { %21 = dma.vmem_to_smem %s19_s23, 16, %s231_s24, [#allocation4]  }
   0x3   :  { %227 = dma.done.wait [#allocation4], 16  }
   0x4   :  { %228 = vsyncadd [#allocation4], 4294967280 }
   0x5   :  { %36 = sfence }
   0x6   :  { %v42_v0 = vld [vmem:[%s314_s3 + $0x18] sm:$0xff]  ;;  %v41_v2 = vld [vmem:[%s314_s3 + $0x10] sm:$0xff]  ;;  %v40_v4 = vld [vmem:[%s314_s3 + $0x8] sm:$0xff]  ;;  %vm43_vm0 = vcmask 261120   ;;  %vm102_vm1 = vcmask 64512   ;;  %s235_s22 = smov 121  }
   0x7   :  { %v70_v1 = vld [vmem:[%s315_s4 + $0x18] sm:$0xff]  ;;  %59 = vmatpush.msra.mxu0 %v42_v0  ;;  %v69_v3 = vld [vmem:[%s315_s4 + $0x10] sm:$0xff]  ;;  %v68_v5 = vld [vmem:[%s315_s4 + $0x8] sm:$0xff]  ;;  %s111_s23 = sld [smem:[#allocation2]]  ;;  %vm153_vm4 = vcmask 130048   ;;  %s236_s24 = smov [#allocation5]  }
   0x8   :  { %86 = vmatpush.msra.mxu1 %v70_v1  ;;  %v186_v6 = vld [vmem:[%s316_s5] ss:$0 sm:$0xff]  ;;  %s232_s5 = smov 8   ;;  %s164_s25 = sshll.u32 %s236_s24, 4  ;;  %vm155_vm5 = vcmask 138240   ;;  %vm157_vm6 = vcmask 146432   ;;  %s165_s25 = int_to_ptr.vmem [resolvable:$true] %s164_s25 }
   0x9   :  { %60 = vmatpush.msra.mxu0 %v41_v2  ;;  %v39_v7 = vld [vmem:[%s314_s3] sm:$0xff]  ;;  %97 = vrot.lane.b32.xlu1 %v186_v6, %s232_s5  ;;  %s233_s3 = smov 120   ;;  %s166_s28 = sshll.u32 %s317_s6, 4  ;;  %s167_s28 = int_to_ptr.hbm [resolvable:$true] %s166_s28 }
   0xa   :  { %87 = vmatpush.msra.mxu1 %v69_v3  ;;  %v67_v8 = vld [vmem:[%s315_s4] sm:$0xff]  ;;  %s179_s4 = sld [smem:[#allocation2 + $0x2]] }
   0xb   :  { %61 = vmatpush.msra.mxu0 %v40_v4  ;;  %v37_v9 = vld [vmem:[%s312_s1] sm:$0xff]  ;;  %s234_s1 = smov 16  }
   0xc   :  { %88 = vmatpush.msra.mxu1 %v68_v5  ;;  %v38_v10 = vld [vmem:[%s313_s2] sm:$0xff]  ;;  %s178_s2 = sld [smem:[#allocation2 + $0x1]] }
   0xd   :  { %62 = vmatpush.msra.mxu0 %v39_v7  ;;  %v112_v45 = vstv %s111_s23 }
   0xe   :  { %89 = vmatpush.msra.mxu1 %v67_v8  ;;  %176 = vmatmul.msk.f32.vlgmr.msra.gmra.mxu0 %vm43_vm0, %v37_v9 }
   0xf   :  { %177 = vmatmul.msk.f32.vlgmr.msra.gmra.mxu1 %vm43_vm0, %v38_v10 }
  0x10   :  { %v124_v25 = vstv %s179_s4 }
  0x12   :  { %v120_v21 = vstv %s178_s2 }
  0x7b   :  { %v98_v11 = vpop.permute.xlu1 %97 }
  0x8b   :  { %v64_v12 = vpop.f32.mrf.mxu0 }
  0x8c   :  { %v91_v13 = vpop.f32.mrf.mxu1  ;;  %v100_v16 = vadd.f32 %v98_v11, %v64_v12 }
  0x8d   :  { %v101_v14 = vmul.f32 %v91_v13, %v64_v12  ;;  %v106_v15 = vsub.f32 %v64_v12, %v91_v13 }
  0x8e   :  { %146 = vrot.lane.b32.xlu2 %v100_v16, %s233_s3 }
  0x8f   :  { %v103_v17 = vsel %vm102_vm1, %v101_v14, 0.0  ;;  %v107_v18 = vand.u32 2147483647, %v106_v15 }
  0x90   :  { %104 = vadd.xlane.f32.xlu1 %v103_v17 }
  0x91   :  { %v108_v19 = vsel %vm102_vm1, %v107_v18, 0.0 }
  0x92   :  { %109 = vadd.xlane.f32.xlu0 %v108_v19 }
  0xa6   :  { %115 = vrot.lane.b32.xlu0 %v91_v13, %s234_s1 }
  0xe8   :  { %v147_v44 = vpop.permute.xlu2 %146 }
 0x103   :  { %v105_v46 = vpop.xlane.xlu1 %104 }
 0x104   :  { %v113_v47 = vadd.f32 %v112_v45, %v105_v46 }
 0x105   :  { %v110_v20 = vpop.xlane.xlu0 %109 }
 0x106   :  { %v121_v23 = vmul.f32 %v120_v21, %v110_v20  ;;  %v154_v48 = vsel %vm153_vm4, %v147_v44, %v113_v47 }
 0x118   :  { %v116_v22 = vpop.permute.xlu0 %115 }
 0x119   :  { %v118_v24 = vadd.f32 %v116_v22, %v64_v12 }
 0x11b   :  { %v122_v26 = vadd.f32 %v121_v23, %v118_v24 }
 0x11d   :  { %v125_v27 = vadd.f32 %v124_v25, %v122_v26 }
 0x11f   :  { %v129_v28 = vand.u32 2147483647, %v125_v27  ;;  %v126_v39 = vmax.f32 %v125_v27, 0.0  ;;  %vm127_vm3 = vcmp.ne.f32.partialorder %v125_v27, %v125_v27 }
 0x121   :  { %v130_v29 = vsub.f32 0.0, %v129_v28 }
 0x123   :  { %v131_v30 = vmul.f32 1.442695, %v130_v29 }
 0x125   :  { %187 = vpow2.f32 %v131_v30 }
 0x12b   :  { %v188_v31 = vpop.eup %187 }
 0x12c   :  { %v133_v32 = vadd.f32 1.0, %v188_v31  ;;  %v136_v33 = vmul.f32 -0.5, %v188_v31  ;;  %v139_v35 = vand.u32 2147483647, %v188_v31 }
 0x12e   :  { %189 = vlog2.f32 %v133_v32  ;;  %v137_v34 = vadd.f32 1.0, %v136_v33  ;;  %vm140_vm2 = vcmp.lt.f32.partialorder %v139_v35, 0.0004427343 }
 0x130   :  { %v138_v38 = vmul.f32 %v188_v31, %v137_v34 }
 0x134   :  { %v190_v36 = vpop.eup %189 }
 0x135   :  { %v135_v37 = vmul.f32 0.6931472, %v190_v36 }
 0x137   :  { %v141_v40 = vsel %vm140_vm2, %v138_v38, %v135_v37 }
 0x138   :  { %v142_v41 = vadd.f32 %v141_v40, %v126_v39 }
 0x13a   :  { %v143_v42 = vsel %vm127_vm3, %v125_v27, %v142_v41 }
 0x13b   :  { %v144_v43 = vadd.f32 0.0001, %v143_v42 }
 0x13d   :  { %150 = vrot.lane.b32.xlu2 %v144_v43, %s235_s22 }
 0x197   :  { %v151_v49 = vpop.permute.xlu2 %150 }
 0x198   :  { %v156_v50 = vsel %vm155_vm5, %v154_v48, %v151_v49 }
 0x199   :  { %158 = vst.msk [vmem:[#allocation5] sm:$0xff] %vm157_vm6, %v156_v50 }
 0x19a   :  { %169 = dma.vmem_to_hbm [thread:$0]  %s165_s25, 128, %s167_s28, [#allocation3]  }
 0x19b   :  { %229 = dma.done.wait [#allocation3], 128  }
 0x19c   :  { %230 = vsyncadd [#allocation3], 4294967168 }
 0x19d   :  { %174 = vsyncpa [#allocation3], 1 }
 0x19e   :  { %175 = vsyncpa [#allocation4], 1 }

</bundles_post_ra>
